<compile_context>
chip_gen: v7x
topology: tpu7x:2x2x1
jax: 0.10.0
libtpu: 0.0.40
codegen_flags: <defaults>
</compile_context>

<pallas_src>
import functools

import jax
import jax.numpy as jnp
from jax import lax
from jax.experimental import pallas as pl
from jax.experimental.pallas import tpu as pltpu


# ----------------------------------------------------------------------------
# Single fused kernel: per batch element
#   qkv  = x @ Wqkv            (scale already folded into the Q columns)
#   for each head h:
#       attn_h = softmax(q_h k_h^T + rel_bias_h)
#       acc   += (attn_h @ v_h) @ Wp[h*hd:(h+1)*hd, :]   (fused concat+proj)
#   out  = acc + bp
# ----------------------------------------------------------------------------
def fused_attn_kernel(x_ref, wqkv_ref, bias_ref, wp_ref, bp_ref, o_ref, *,
                      num_heads):
    x = x_ref[0]                                    # (N, C)
    wqkv = wqkv_ref[...]                            # (C, 3C)
    wp = wp_ref[...]                                # (C, C)
    bp = bp_ref[...]                                # (1, C)

    N, C = x.shape
    hd = C // num_heads

    # One wide, lane-dense QKV matmul (output width = 3C).
    qkv = jnp.dot(x, wqkv, preferred_element_type=jnp.float32)   # (N, 3C)

    acc = jnp.zeros((N, C), jnp.float32)
    # Static Python loop over heads (H is small); per-head slices are static.
    for h in range(num_heads):
        q = qkv[:, h * hd:(h + 1) * hd]                          # (N, hd), pre-scaled
        k = qkv[:, C + h * hd:C + (h + 1) * hd]                  # (N, hd)
        v = qkv[:, 2 * C + h * hd:2 * C + (h + 1) * hd]          # (N, hd)

        # q @ k^T without explicit transpose: contract over last dims.
        attn = lax.dot_general(
            q, k, dimension_numbers=(((1,), (1,)), ((), ())),
            preferred_element_type=jnp.float32)                  # (N, N)
        attn = attn + bias_ref[h]                                # (N, N)

        m = jnp.max(attn, axis=-1, keepdims=True)
        e = jnp.exp(attn - m)
        s = jnp.sum(e, axis=-1, keepdims=True)
        p = e / s                                                # exact softmax

        o_h = jnp.dot(p, v, preferred_element_type=jnp.float32)  # (N, hd)
        # Fused head-concat + projection: output rows of Wp for this head.
        acc = acc + jnp.dot(o_h, wp[h * hd:(h + 1) * hd, :],
                            preferred_element_type=jnp.float32)  # (N, C)

    y = acc + bp                                                 # (N, C)
    o_ref[0] = y.astype(o_ref.dtype)


# ----------------------------------------------------------------------------
# One-time parameter preparation (hoisted out of the per-call hot path):
#   * fold the softmax scale into the Q columns of the fused QKV weight
#   * precompute the (H, N, N) relative-position bias from the table
# ----------------------------------------------------------------------------
def prepare_attention_params(params, *, num_heads, num_ttokens):
    qkv_w = params["qkv_w"]                          # (C, 3C), y = x @ W layout
    C = qkv_w.shape[0]
    hd = C // num_heads
    scale = hd ** (-0.5)

    wqkv = jnp.concatenate([qkv_w[:, :C] * scale, qkv_w[:, C:]], axis=1)  # (C, 3C)

    N = num_ttokens
    coords = jnp.arange(N)
    rel = ((coords[:, None] - coords[None, :]) + (N - 1)).reshape(-1)
    rel_bias = (params["rel_table"][rel]
                .reshape(N, N, num_heads)
                .transpose(2, 0, 1)
                .astype(jnp.float32))                # (H, N, N)

    return {
        "wqkv": wqkv.astype(jnp.float32),
        "rel_bias": rel_bias,
        "proj_w": params["proj_w"].astype(jnp.float32),   # (C, C)
        "proj_b": params["proj_b"].astype(jnp.float32),   # (1, C)
    }


@functools.partial(jax.jit, static_argnames=("num_heads",))
def attention_forward(x, prep, *, num_heads):
    """x: (B, N, C) float32.  prep: output of prepare_attention_params."""
    B, N, C = x.shape
    H = num_heads

    return pl.pallas_call(
        functools.partial(fused_attn_kernel, num_heads=H),
        out_shape=jax.ShapeDtypeStruct((B, N, C), x.dtype),
        grid_spec=pltpu.PrefetchScalarGridSpec(
            num_scalar_prefetch=0,
            grid=(B,),                                          # parallel batch axis
            in_specs=[
                pl.BlockSpec((1, N, C), lambda b: (b, 0, 0)),   # x
                pl.BlockSpec((C, 3 * C), lambda b: (0, 0)),     # fused qkv weight
                pl.BlockSpec((H, N, N), lambda b: (0, 0, 0)),   # rel bias (all heads)
                pl.BlockSpec((C, C), lambda b: (0, 0)),         # proj weight
                pl.BlockSpec((1, C), lambda b: (0, 0)),         # proj bias
            ],
            out_specs=pl.BlockSpec((1, N, C), lambda b: (b, 0, 0)),  # lane-dense out
        ),
        compiler_params=pltpu.CompilerParams(
            dimension_semantics=("parallel",)),
    )(x, prep["wqkv"], prep["rel_bias"], prep["proj_w"], prep["proj_b"])


# ----------------------------------------------------------------------------
# Pure-JAX reference mirroring the PyTorch module (eval mode, no dropout)
# ----------------------------------------------------------------------------
def reference_forward(x, params, *, num_heads):
    B, N, C = x.shape
    H = num_heads
    hd = C // H
    scale = hd ** (-0.5)

    qkv = x @ params["qkv_w"]                                   # (B, N, 3C)
    qkv = qkv.reshape(B, N, 3, H, hd).transpose(2, 0, 3, 1, 4)  # (3, B, H, N, hd)
    q, k, v = qkv[0], qkv[1], qkv[2]

    coords = jnp.arange(N)
    rel = ((coords[:, None] - coords[None, :]) + (N - 1)).reshape(-1)
    bias = params["rel_table"][rel].reshape(N, N, H).transpose(2, 0, 1)  # (H, N, N)

    attn = (q @ jnp.swapaxes(k, -2, -1)) * scale + bias[None]
    attn = jax.nn.softmax(attn, axis=-1)
    o = (attn @ v).transpose(0, 2, 1, 3).reshape(B, N, C)
    return o @ params["proj_w"] + params["proj_b"][0]


def init_params(key, dim, num_ttokens, num_heads):
    k1, k2, k3, k4 = jax.random.split(key, 4)
    # qkv: Linear(dim, 3*dim, bias=False) stored as (dim, 3*dim) so y = x @ W
    qkv_w = jax.random.normal(k1, (dim, 3 * dim), jnp.float32) * 0.02
    # proj: Linear(dim, dim) with bias -> (dim, dim) and (1, dim)
    proj_w = jax.random.normal(k2, (dim, dim), jnp.float32) * 0.02
    proj_b = jax.random.normal(k3, (1, dim), jnp.float32) * 0.02
    # relative_position_bias_table: (2*num_ttokens - 1, num_heads)
    rel_table = (jnp.clip(jax.random.normal(k4, (2 * num_ttokens - 1, num_heads)),
                          -2.0, 2.0) * 0.02).astype(jnp.float32)
    return {"qkv_w": qkv_w, "proj_w": proj_w, "proj_b": proj_b,
            "rel_table": rel_table}


if __name__ == "__main__":
    B = 2
    num_ttokens = 8      # N (sequence length == num_ttokens so the bias applies)
    dim = 32             # C
    num_heads = 8        # head_dim = 4

    key = jax.random.PRNGKey(0)
    kx, kp = jax.random.split(key)
    x = jax.random.normal(kx, (B, num_ttokens, dim), jnp.float32)
    params = init_params(kp, dim, num_ttokens, num_heads)

    # One-time parameter prep (hoisted out of the per-forward hot path).
    prep = prepare_attention_params(params, num_heads=num_heads,
                                    num_ttokens=num_ttokens)
    prep = jax.tree_util.tree_map(jax.block_until_ready, prep)

    out = attention_forward(x, prep, num_heads=num_heads)
    out = jax.block_until_ready(out)

    ref = reference_forward(x, params, num_heads=num_heads)
    assert out.shape == (B, num_ttokens, dim)
    assert jnp.allclose(out, ref, atol=1e-4, rtol=1e-4), "mismatch vs reference"

    print("KERNEL_OK")
</pallas_src>

<mosaic_0001>
module attributes {stable_mosaic.version = 11 : i64} {
  func.func @fused_attn_kernel(%arg0: i32, %arg1: memref<1x8x32xf32, #tpu.memory_space<vmem>>, %arg2: memref<32x96xf32, #tpu.memory_space<vmem>>, %arg3: memref<8x8x8xf32, #tpu.memory_space<vmem>>, %arg4: memref<32x32xf32, #tpu.memory_space<vmem>>, %arg5: memref<1x32xf32, #tpu.memory_space<vmem>>, %arg6: memref<1x8x32xf32, #tpu.memory_space<vmem>>) attributes {dimension_semantics = [#tpu.dimension_semantics<parallel>], iteration_bounds = array<i64: 2>, scalar_prefetch = 0 : i64, scratch_operands = 0 : i64, tpu.core_type = #tpu.core_type<tc>, window_params = [{transform_indices = @transform_0, window_bounds = array<i64: 1, 8, 32>}, {pipeline_mode = #tpu.pipeline_mode<synchronous>, transform_indices = @transform_1, window_bounds = array<i64: 32, 96>}, {pipeline_mode = #tpu.pipeline_mode<synchronous>, transform_indices = @transform_2, window_bounds = array<i64: 8, 8, 8>}, {pipeline_mode = #tpu.pipeline_mode<synchronous>, transform_indices = @transform_3, window_bounds = array<i64: 32, 32>}, {pipeline_mode = #tpu.pipeline_mode<synchronous>, transform_indices = @transform_4, window_bounds = array<i64: 1, 32>}, {transform_indices = @transform_5, window_bounds = array<i64: 1, 8, 32>}]} {
    %c0 = arith.constant 0 : index
    %c0_0 = arith.constant 0 : index
    %c0_1 = arith.constant 0 : index
    %0 = vector.load %arg1[%c0, %c0_0, %c0_1] : memref<1x8x32xf32, #tpu.memory_space<vmem>>, vector<1x8x32xf32>
    %1 = vector.shape_cast %0 : vector<1x8x32xf32> to vector<8x32xf32>
    %c0_2 = arith.constant 0 : index
    %c0_3 = arith.constant 0 : index
    %2 = vector.load %arg2[%c0_2, %c0_3] : memref<32x96xf32, #tpu.memory_space<vmem>>, vector<32x96xf32>
    %c0_4 = arith.constant 0 : index
    %c0_5 = arith.constant 0 : index
    %3 = vector.load %arg4[%c0_4, %c0_5] : memref<32x32xf32, #tpu.memory_space<vmem>>, vector<32x32xf32>
    %c0_6 = arith.constant 0 : index
    %c0_7 = arith.constant 0 : index
    %4 = vector.load %arg5[%c0_6, %c0_7] : memref<1x32xf32, #tpu.memory_space<vmem>>, vector<1x32xf32>
    %cst = arith.constant dense<0.000000e+00> : vector<8x96xf32>
    %5 = tpu.matmul %1, %2, %cst {dimension_numbers = #tpu.dot_dimension_numbers<[1], [0], [0], [1], [0, 0, 1, 1], [], []>} : vector<8x32xf32>, vector<32x96xf32>, vector<8x96xf32> -> vector<8x96xf32>
    %cst_8 = arith.constant 0.000000e+00 : f32
    %6 = vector.broadcast %cst_8 : f32 to vector<8x32xf32>
    %7 = vector.extract_strided_slice %5 {offsets = [0, 0], sizes = [8, 4], strides = [1, 1]} : vector<8x96xf32> to vector<8x4xf32>
    %8 = vector.extract_strided_slice %5 {offsets = [0, 32], sizes = [8, 4], strides = [1, 1]} : vector<8x96xf32> to vector<8x4xf32>
    %9 = vector.extract_strided_slice %5 {offsets = [0, 64], sizes = [8, 4], strides = [1, 1]} : vector<8x96xf32> to vector<8x4xf32>
    %cst_9 = arith.constant dense<0.000000e+00> : vector<8x8xf32>
    %10 = tpu.matmul %7, %8, %cst_9 {dimension_numbers = #tpu.dot_dimension_numbers<[1], [1], [0], [0], [0, 0, 1, 0], [], []>} : vector<8x4xf32>, vector<8x4xf32>, vector<8x8xf32> -> vector<8x8xf32>
    %c0_10 = arith.constant 0 : index
    %c0_11 = arith.constant 0 : index
    %c0_12 = arith.constant 0 : index
    %11 = vector.load %arg3[%c0_10, %c0_11, %c0_12] : memref<8x8x8xf32, #tpu.memory_space<vmem>>, vector<1x8x8xf32>
    %12 = vector.shape_cast %11 : vector<1x8x8xf32> to vector<8x8xf32>
    %13 = arith.addf %10, %12 : vector<8x8xf32>
    %cst_13 = arith.constant dense<0xFF800000> : vector<8xf32>
    %14 = vector.multi_reduction <maximumf>, %13, %cst_13 [1] : vector<8x8xf32> to vector<8xf32>
    %15 = vector.shape_cast %14 : vector<8xf32> to vector<8x1xf32>
    %16 = vector.broadcast %15 : vector<8x1xf32> to vector<8x8xf32>
    %17 = arith.subf %13, %16 : vector<8x8xf32>
    %18 = math.exp %17 : vector<8x8xf32>
    %cst_14 = arith.constant dense<0.000000e+00> : vector<8xf32>
    %19 = vector.multi_reduction <add>, %18, %cst_14 [1] : vector<8x8xf32> to vector<8xf32>
    %20 = vector.shape_cast %19 : vector<8xf32> to vector<8x1xf32>
    %21 = vector.broadcast %20 : vector<8x1xf32> to vector<8x8xf32>
    %22 = arith.divf %18, %21 : vector<8x8xf32>
    %cst_15 = arith.constant dense<0.000000e+00> : vector<8x4xf32>
    %23 = tpu.matmul %22, %9, %cst_15 {dimension_numbers = #tpu.dot_dimension_numbers<[1], [0], [0], [1], [0, 0, 1, 1], [], []>} : vector<8x8xf32>, vector<8x4xf32>, vector<8x4xf32> -> vector<8x4xf32>
    %24 = vector.extract_strided_slice %3 {offsets = [0, 0], sizes = [4, 32], strides = [1, 1]} : vector<32x32xf32> to vector<4x32xf32>
    %cst_16 = arith.constant dense<0.000000e+00> : vector<8x32xf32>
    %25 = tpu.matmul %23, %24, %cst_16 {dimension_numbers = #tpu.dot_dimension_numbers<[1], [0], [0], [1], [0, 0, 1, 1], [], []>} : vector<8x4xf32>, vector<4x32xf32>, vector<8x32xf32> -> vector<8x32xf32>
    %26 = arith.addf %6, %25 : vector<8x32xf32>
    %27 = vector.extract_strided_slice %5 {offsets = [0, 4], sizes = [8, 4], strides = [1, 1]} : vector<8x96xf32> to vector<8x4xf32>
    %28 = vector.extract_strided_slice %5 {offsets = [0, 36], sizes = [8, 4], strides = [1, 1]} : vector<8x96xf32> to vector<8x4xf32>
    %29 = vector.extract_strided_slice %5 {offsets = [0, 68], sizes = [8, 4], strides = [1, 1]} : vector<8x96xf32> to vector<8x4xf32>
    %cst_17 = arith.constant dense<0.000000e+00> : vector<8x8xf32>
    %30 = tpu.matmul %27, %28, %cst_17 {dimension_numbers = #tpu.dot_dimension_numbers<[1], [1], [0], [0], [0, 0, 1, 0], [], []>} : vector<8x4xf32>, vector<8x4xf32>, vector<8x8xf32> -> vector<8x8xf32>
    %c1 = arith.constant 1 : index
    %c0_18 = arith.constant 0 : index
    %c0_19 = arith.constant 0 : index
    %31 = vector.load %arg3[%c1, %c0_18, %c0_19] : memref<8x8x8xf32, #tpu.memory_space<vmem>>, vector<1x8x8xf32>
    %32 = vector.shape_cast %31 : vector<1x8x8xf32> to vector<8x8xf32>
    %33 = arith.addf %30, %32 : vector<8x8xf32>
    %cst_20 = arith.constant dense<0xFF800000> : vector<8xf32>
    %34 = vector.multi_reduction <maximumf>, %33, %cst_20 [1] : vector<8x8xf32> to vector<8xf32>
    %35 = vector.shape_cast %34 : vector<8xf32> to vector<8x1xf32>
    %36 = vector.broadcast %35 : vector<8x1xf32> to vector<8x8xf32>
    %37 = arith.subf %33, %36 : vector<8x8xf32>
    %38 = math.exp %37 : vector<8x8xf32>
    %cst_21 = arith.constant dense<0.000000e+00> : vector<8xf32>
    %39 = vector.multi_reduction <add>, %38, %cst_21 [1] : vector<8x8xf32> to vector<8xf32>
    %40 = vector.shape_cast %39 : vector<8xf32> to vector<8x1xf32>
    %41 = vector.broadcast %40 : vector<8x1xf32> to vector<8x8xf32>
    %42 = arith.divf %38, %41 : vector<8x8xf32>
    %cst_22 = arith.constant dense<0.000000e+00> : vector<8x4xf32>
    %43 = tpu.matmul %42, %29, %cst_22 {dimension_numbers = #tpu.dot_dimension_numbers<[1], [0], [0], [1], [0, 0, 1, 1], [], []>} : vector<8x8xf32>, vector<8x4xf32>, vector<8x4xf32> -> vector<8x4xf32>
    %44 = vector.extract_strided_slice %3 {offsets = [4, 0], sizes = [4, 32], strides = [1, 1]} : vector<32x32xf32> to vector<4x32xf32>
    %cst_23 = arith.constant dense<0.000000e+00> : vector<8x32xf32>
    %45 = tpu.matmul %43, %44, %cst_23 {dimension_numbers = #tpu.dot_dimension_numbers<[1], [0], [0], [1], [0, 0, 1, 1], [], []>} : vector<8x4xf32>, vector<4x32xf32>, vector<8x32xf32> -> vector<8x32xf32>
    %46 = arith.addf %26, %45 : vector<8x32xf32>
    %47 = vector.extract_strided_slice %5 {offsets = [0, 8], sizes = [8, 4], strides = [1, 1]} : vector<8x96xf32> to vector<8x4xf32>
    %48 = vector.extract_strided_slice %5 {offsets = [0, 40], sizes = [8, 4], strides = [1, 1]} : vector<8x96xf32> to vector<8x4xf32>
    %49 = vector.extract_strided_slice %5 {offsets = [0, 72], sizes = [8, 4], strides = [1, 1]} : vector<8x96xf32> to vector<8x4xf32>
    %cst_24 = arith.constant dense<0.000000e+00> : vector<8x8xf32>
    %50 = tpu.matmul %47, %48, %cst_24 {dimension_numbers = #tpu.dot_dimension_numbers<[1], [1], [0], [0], [0, 0, 1, 0], [], []>} : vector<8x4xf32>, vector<8x4xf32>, vector<8x8xf32> -> vector<8x8xf32>
    %c2 = arith.constant 2 : index
    %c0_25 = arith.constant 0 : index
    %c0_26 = arith.constant 0 : index
    %51 = vector.load %arg3[%c2, %c0_25, %c0_26] : memref<8x8x8xf32, #tpu.memory_space<vmem>>, vector<1x8x8xf32>
    %52 = vector.shape_cast %51 : vector<1x8x8xf32> to vector<8x8xf32>
    %53 = arith.addf %50, %52 : vector<8x8xf32>
    %cst_27 = arith.constant dense<0xFF800000> : vector<8xf32>
    %54 = vector.multi_reduction <maximumf>, %53, %cst_27 [1] : vector<8x8xf32> to vector<8xf32>
    %55 = vector.shape_cast %54 : vector<8xf32> to vector<8x1xf32>
    %56 = vector.broadcast %55 : vector<8x1xf32> to vector<8x8xf32>
    %57 = arith.subf %53, %56 : vector<8x8xf32>
    %58 = math.exp %57 : vector<8x8xf32>
    %cst_28 = arith.constant dense<0.000000e+00> : vector<8xf32>
    %59 = vector.multi_reduction <add>, %58, %cst_28 [1] : vector<8x8xf32> to vector<8xf32>
    %60 = vector.shape_cast %59 : vector<8xf32> to vector<8x1xf32>
    %61 = vector.broadcast %60 : vector<8x1xf32> to vector<8x8xf32>
    %62 = arith.divf %58, %61 : vector<8x8xf32>
    %cst_29 = arith.constant dense<0.000000e+00> : vector<8x4xf32>
    %63 = tpu.matmul %62, %49, %cst_29 {dimension_numbers = #tpu.dot_dimension_numbers<[1], [0], [0], [1], [0, 0, 1, 1], [], []>} : vector<8x8xf32>, vector<8x4xf32>, vector<8x4xf32> -> vector<8x4xf32>
    %64 = vector.extract_strided_slice %3 {offsets = [8, 0], sizes = [4, 32], strides = [1, 1]} : vector<32x32xf32> to vector<4x32xf32>
    %cst_30 = arith.constant dense<0.000000e+00> : vector<8x32xf32>
    %65 = tpu.matmul %63, %64, %cst_30 {dimension_numbers = #tpu.dot_dimension_numbers<[1], [0], [0], [1], [0, 0, 1, 1], [], []>} : vector<8x4xf32>, vector<4x32xf32>, vector<8x32xf32> -> vector<8x32xf32>
    %66 = arith.addf %46, %65 : vector<8x32xf32>
    %67 = vector.extract_strided_slice %5 {offsets = [0, 12], sizes = [8, 4], strides = [1, 1]} : vector<8x96xf32> to vector<8x4xf32>
    %68 = vector.extract_strided_slice %5 {offsets = [0, 44], sizes = [8, 4], strides = [1, 1]} : vector<8x96xf32> to vector<8x4xf32>
    %69 = vector.extract_strided_slice %5 {offsets = [0, 76], sizes = [8, 4], strides = [1, 1]} : vector<8x96xf32> to vector<8x4xf32>
    %cst_31 = arith.constant dense<0.000000e+00> : vector<8x8xf32>
    %70 = tpu.matmul %67, %68, %cst_31 {dimension_numbers = #tpu.dot_dimension_numbers<[1], [1], [0], [0], [0, 0, 1, 0], [], []>} : vector<8x4xf32>, vector<8x4xf32>, vector<8x8xf32> -> vector<8x8xf32>
    %c3 = arith.constant 3 : index
    %c0_32 = arith.constant 0 : index
    %c0_33 = arith.constant 0 : index
    %71 = vector.load %arg3[%c3, %c0_32, %c0_33] : memref<8x8x8xf32, #tpu.memory_space<vmem>>, vector<1x8x8xf32>
    %72 = vector.shape_cast %71 : vector<1x8x8xf32> to vector<8x8xf32>
    %73 = arith.addf %70, %72 : vector<8x8xf32>
    %cst_34 = arith.constant dense<0xFF800000> : vector<8xf32>
    %74 = vector.multi_reduction <maximumf>, %73, %cst_34 [1] : vector<8x8xf32> to vector<8xf32>
    %75 = vector.shape_cast %74 : vector<8xf32> to vector<8x1xf32>
    %76 = vector.broadcast %75 : vector<8x1xf32> to vector<8x8xf32>
    %77 = arith.subf %73, %76 : vector<8x8xf32>
    %78 = math.exp %77 : vector<8x8xf32>
    %cst_35 = arith.constant dense<0.000000e+00> : vector<8xf32>
    %79 = vector.multi_reduction <add>, %78, %cst_35 [1] : vector<8x8xf32> to vector<8xf32>
    %80 = vector.shape_cast %79 : vector<8xf32> to vector<8x1xf32>
    %81 = vector.broadcast %80 : vector<8x1xf32> to vector<8x8xf32>
    %82 = arith.divf %78, %81 : vector<8x8xf32>
    %cst_36 = arith.constant dense<0.000000e+00> : vector<8x4xf32>
    %83 = tpu.matmul %82, %69, %cst_36 {dimension_numbers = #tpu.dot_dimension_numbers<[1], [0], [0], [1], [0, 0, 1, 1], [], []>} : vector<8x8xf32>, vector<8x4xf32>, vector<8x4xf32> -> vector<8x4xf32>
    %84 = vector.extract_strided_slice %3 {offsets = [12, 0], sizes = [4, 32], strides = [1, 1]} : vector<32x32xf32> to vector<4x32xf32>
    %cst_37 = arith.constant dense<0.000000e+00> : vector<8x32xf32>
    %85 = tpu.matmul %83, %84, %cst_37 {dimension_numbers = #tpu.dot_dimension_numbers<[1], [0], [0], [1], [0, 0, 1, 1], [], []>} : vector<8x4xf32>, vector<4x32xf32>, vector<8x32xf32> -> vector<8x32xf32>
    %86 = arith.addf %66, %85 : vector<8x32xf32>
    %87 = vector.extract_strided_slice %5 {offsets = [0, 16], sizes = [8, 4], strides = [1, 1]} : vector<8x96xf32> to vector<8x4xf32>
    %88 = vector.extract_strided_slice %5 {offsets = [0, 48], sizes = [8, 4], strides = [1, 1]} : vector<8x96xf32> to vector<8x4xf32>
    %89 = vector.extract_strided_slice %5 {offsets = [0, 80], sizes = [8, 4], strides = [1, 1]} : vector<8x96xf32> to vector<8x4xf32>
    %cst_38 = arith.constant dense<0.000000e+00> : vector<8x8xf32>
    %90 = tpu.matmul %87, %88, %cst_38 {dimension_numbers = #tpu.dot_dimension_numbers<[1], [1], [0], [0], [0, 0, 1, 0], [], []>} : vector<8x4xf32>, vector<8x4xf32>, vector<8x8xf32> -> vector<8x8xf32>
    %c4 = arith.constant 4 : index
    %c0_39 = arith.constant 0 : index
    %c0_40 = arith.constant 0 : index
    %91 = vector.load %arg3[%c4, %c0_39, %c0_40] : memref<8x8x8xf32, #tpu.memory_space<vmem>>, vector<1x8x8xf32>
    %92 = vector.shape_cast %91 : vector<1x8x8xf32> to vector<8x8xf32>
    %93 = arith.addf %90, %92 : vector<8x8xf32>
    %cst_41 = arith.constant dense<0xFF800000> : vector<8xf32>
    %94 = vector.multi_reduction <maximumf>, %93, %cst_41 [1] : vector<8x8xf32> to vector<8xf32>
    %95 = vector.shape_cast %94 : vector<8xf32> to vector<8x1xf32>
    %96 = vector.broadcast %95 : vector<8x1xf32> to vector<8x8xf32>
    %97 = arith.subf %93, %96 : vector<8x8xf32>
    %98 = math.exp %97 : vector<8x8xf32>
    %cst_42 = arith.constant dense<0.000000e+00> : vector<8xf32>
    %99 = vector.multi_reduction <add>, %98, %cst_42 [1] : vector<8x8xf32> to vector<8xf32>
    %100 = vector.shape_cast %99 : vector<8xf32> to vector<8x1xf32>
    %101 = vector.broadcast %100 : vector<8x1xf32> to vector<8x8xf32>
    %102 = arith.divf %98, %101 : vector<8x8xf32>
    %cst_43 = arith.constant dense<0.000000e+00> : vector<8x4xf32>
    %103 = tpu.matmul %102, %89, %cst_43 {dimension_numbers = #tpu.dot_dimension_numbers<[1], [0], [0], [1], [0, 0, 1, 1], [], []>} : vector<8x8xf32>, vector<8x4xf32>, vector<8x4xf32> -> vector<8x4xf32>
    %104 = vector.extract_strided_slice %3 {offsets = [16, 0], sizes = [4, 32], strides = [1, 1]} : vector<32x32xf32> to vector<4x32xf32>
    %cst_44 = arith.constant dense<0.000000e+00> : vector<8x32xf32>
    %105 = tpu.matmul %103, %104, %cst_44 {dimension_numbers = #tpu.dot_dimension_numbers<[1], [0], [0], [1], [0, 0, 1, 1], [], []>} : vector<8x4xf32>, vector<4x32xf32>, vector<8x32xf32> -> vector<8x32xf32>
    %106 = arith.addf %86, %105 : vector<8x32xf32>
    %107 = vector.extract_strided_slice %5 {offsets = [0, 20], sizes = [8, 4], strides = [1, 1]} : vector<8x96xf32> to vector<8x4xf32>
    %108 = vector.extract_strided_slice %5 {offsets = [0, 52], sizes = [8, 4], strides = [1, 1]} : vector<8x96xf32> to vector<8x4xf32>
    %109 = vector.extract_strided_slice %5 {offsets = [0, 84], sizes = [8, 4], strides = [1, 1]} : vector<8x96xf32> to vector<8x4xf32>
    %cst_45 = arith.constant dense<0.000000e+00> : vector<8x8xf32>
    %110 = tpu.matmul %107, %108, %cst_45 {dimension_numbers = #tpu.dot_dimension_numbers<[1], [1], [0], [0], [0, 0, 1, 0], [], []>} : vector<8x4xf32>, vector<8x4xf32>, vector<8x8xf32> -> vector<8x8xf32>
    %c5 = arith.constant 5 : index
    %c0_46 = arith.constant 0 : index
    %c0_47 = arith.constant 0 : index
    %111 = vector.load %arg3[%c5, %c0_46, %c0_47] : memref<8x8x8xf32, #tpu.memory_space<vmem>>, vector<1x8x8xf32>
    %112 = vector.shape_cast %111 : vector<1x8x8xf32> to vector<8x8xf32>
    %113 = arith.addf %110, %112 : vector<8x8xf32>
    %cst_48 = arith.constant dense<0xFF800000> : vector<8xf32>
    %114 = vector.multi_reduction <maximumf>, %113, %cst_48 [1] : vector<8x8xf32> to vector<8xf32>
    %115 = vector.shape_cast %114 : vector<8xf32> to vector<8x1xf32>
    %116 = vector.broadcast %115 : vector<8x1xf32> to vector<8x8xf32>
    %117 = arith.subf %113, %116 : vector<8x8xf32>
    %118 = math.exp %117 : vector<8x8xf32>
    %cst_49 = arith.constant dense<0.000000e+00> : vector<8xf32>
    %119 = vector.multi_reduction <add>, %118, %cst_49 [1] : vector<8x8xf32> to vector<8xf32>
    %120 = vector.shape_cast %119 : vector<8xf32> to vector<8x1xf32>
    %121 = vector.broadcast %120 : vector<8x1xf32> to vector<8x8xf32>
    %122 = arith.divf %118, %121 : vector<8x8xf32>
    %cst_50 = arith.constant dense<0.000000e+00> : vector<8x4xf32>
    %123 = tpu.matmul %122, %109, %cst_50 {dimension_numbers = #tpu.dot_dimension_numbers<[1], [0], [0], [1], [0, 0, 1, 1], [], []>} : vector<8x8xf32>, vector<8x4xf32>, vector<8x4xf32> -> vector<8x4xf32>
    %124 = vector.extract_strided_slice %3 {offsets = [20, 0], sizes = [4, 32], strides = [1, 1]} : vector<32x32xf32> to vector<4x32xf32>
    %cst_51 = arith.constant dense<0.000000e+00> : vector<8x32xf32>
    %125 = tpu.matmul %123, %124, %cst_51 {dimension_numbers = #tpu.dot_dimension_numbers<[1], [0], [0], [1], [0, 0, 1, 1], [], []>} : vector<8x4xf32>, vector<4x32xf32>, vector<8x32xf32> -> vector<8x32xf32>
    %126 = arith.addf %106, %125 : vector<8x32xf32>
    %127 = vector.extract_strided_slice %5 {offsets = [0, 24], sizes = [8, 4], strides = [1, 1]} : vector<8x96xf32> to vector<8x4xf32>
    %128 = vector.extract_strided_slice %5 {offsets = [0, 56], sizes = [8, 4], strides = [1, 1]} : vector<8x96xf32> to vector<8x4xf32>
    %129 = vector.extract_strided_slice %5 {offsets = [0, 88], sizes = [8, 4], strides = [1, 1]} : vector<8x96xf32> to vector<8x4xf32>
    %cst_52 = arith.constant dense<0.000000e+00> : vector<8x8xf32>
    %130 = tpu.matmul %127, %128, %cst_52 {dimension_numbers = #tpu.dot_dimension_numbers<[1], [1], [0], [0], [0, 0, 1, 0], [], []>} : vector<8x4xf32>, vector<8x4xf32>, vector<8x8xf32> -> vector<8x8xf32>
    %c6 = arith.constant 6 : index
    %c0_53 = arith.constant 0 : index
    %c0_54 = arith.constant 0 : index
    %131 = vector.load %arg3[%c6, %c0_53, %c0_54] : memref<8x8x8xf32, #tpu.memory_space<vmem>>, vector<1x8x8xf32>
    %132 = vector.shape_cast %131 : vector<1x8x8xf32> to vector<8x8xf32>
    %133 = arith.addf %130, %132 : vector<8x8xf32>
    %cst_55 = arith.constant dense<0xFF800000> : vector<8xf32>
    %134 = vector.multi_reduction <maximumf>, %133, %cst_55 [1] : vector<8x8xf32> to vector<8xf32>
    %135 = vector.shape_cast %134 : vector<8xf32> to vector<8x1xf32>
    %136 = vector.broadcast %135 : vector<8x1xf32> to vector<8x8xf32>
    %137 = arith.subf %133, %136 : vector<8x8xf32>
    %138 = math.exp %137 : vector<8x8xf32>
    %cst_56 = arith.constant dense<0.000000e+00> : vector<8xf32>
    %139 = vector.multi_reduction <add>, %138, %cst_56 [1] : vector<8x8xf32> to vector<8xf32>
    %140 = vector.shape_cast %139 : vector<8xf32> to vector<8x1xf32>
    %141 = vector.broadcast %140 : vector<8x1xf32> to vector<8x8xf32>
    %142 = arith.divf %138, %141 : vector<8x8xf32>
    %cst_57 = arith.constant dense<0.000000e+00> : vector<8x4xf32>
    %143 = tpu.matmul %142, %129, %cst_57 {dimension_numbers = #tpu.dot_dimension_numbers<[1], [0], [0], [1], [0, 0, 1, 1], [], []>} : vector<8x8xf32>, vector<8x4xf32>, vector<8x4xf32> -> vector<8x4xf32>
    %144 = vector.extract_strided_slice %3 {offsets = [24, 0], sizes = [4, 32], strides = [1, 1]} : vector<32x32xf32> to vector<4x32xf32>
    %cst_58 = arith.constant dense<0.000000e+00> : vector<8x32xf32>
    %145 = tpu.matmul %143, %144, %cst_58 {dimension_numbers = #tpu.dot_dimension_numbers<[1], [0], [0], [1], [0, 0, 1, 1], [], []>} : vector<8x4xf32>, vector<4x32xf32>, vector<8x32xf32> -> vector<8x32xf32>
    %146 = arith.addf %126, %145 : vector<8x32xf32>
    %147 = vector.extract_strided_slice %5 {offsets = [0, 28], sizes = [8, 4], strides = [1, 1]} : vector<8x96xf32> to vector<8x4xf32>
    %148 = vector.extract_strided_slice %5 {offsets = [0, 60], sizes = [8, 4], strides = [1, 1]} : vector<8x96xf32> to vector<8x4xf32>
    %149 = vector.extract_strided_slice %5 {offsets = [0, 92], sizes = [8, 4], strides = [1, 1]} : vector<8x96xf32> to vector<8x4xf32>
    %cst_59 = arith.constant dense<0.000000e+00> : vector<8x8xf32>
    %150 = tpu.matmul %147, %148, %cst_59 {dimension_numbers = #tpu.dot_dimension_numbers<[1], [1], [0], [0], [0, 0, 1, 0], [], []>} : vector<8x4xf32>, vector<8x4xf32>, vector<8x8xf32> -> vector<8x8xf32>
    %c7 = arith.constant 7 : index
    %c0_60 = arith.constant 0 : index
    %c0_61 = arith.constant 0 : index
    %151 = vector.load %arg3[%c7, %c0_60, %c0_61] : memref<8x8x8xf32, #tpu.memory_space<vmem>>, vector<1x8x8xf32>
    %152 = vector.shape_cast %151 : vector<1x8x8xf32> to vector<8x8xf32>
    %153 = arith.addf %150, %152 : vector<8x8xf32>
    %cst_62 = arith.constant dense<0xFF800000> : vector<8xf32>
    %154 = vector.multi_reduction <maximumf>, %153, %cst_62 [1] : vector<8x8xf32> to vector<8xf32>
    %155 = vector.shape_cast %154 : vector<8xf32> to vector<8x1xf32>
    %156 = vector.broadcast %155 : vector<8x1xf32> to vector<8x8xf32>
    %157 = arith.subf %153, %156 : vector<8x8xf32>
    %158 = math.exp %157 : vector<8x8xf32>
    %cst_63 = arith.constant dense<0.000000e+00> : vector<8xf32>
    %159 = vector.multi_reduction <add>, %158, %cst_63 [1] : vector<8x8xf32> to vector<8xf32>
    %160 = vector.shape_cast %159 : vector<8xf32> to vector<8x1xf32>
    %161 = vector.broadcast %160 : vector<8x1xf32> to vector<8x8xf32>
    %162 = arith.divf %158, %161 : vector<8x8xf32>
    %cst_64 = arith.constant dense<0.000000e+00> : vector<8x4xf32>
    %163 = tpu.matmul %162, %149, %cst_64 {dimension_numbers = #tpu.dot_dimension_numbers<[1], [0], [0], [1], [0, 0, 1, 1], [], []>} : vector<8x8xf32>, vector<8x4xf32>, vector<8x4xf32> -> vector<8x4xf32>
    %164 = vector.extract_strided_slice %3 {offsets = [28, 0], sizes = [4, 32], strides = [1, 1]} : vector<32x32xf32> to vector<4x32xf32>
    %cst_65 = arith.constant dense<0.000000e+00> : vector<8x32xf32>
    %165 = tpu.matmul %163, %164, %cst_65 {dimension_numbers = #tpu.dot_dimension_numbers<[1], [0], [0], [1], [0, 0, 1, 1], [], []>} : vector<8x4xf32>, vector<4x32xf32>, vector<8x32xf32> -> vector<8x32xf32>
    %166 = arith.addf %146, %165 : vector<8x32xf32>
    %167 = vector.broadcast %4 : vector<1x32xf32> to vector<8x32xf32>
    %168 = arith.addf %166, %167 : vector<8x32xf32>
    %c0_66 = arith.constant 0 : index
    %c0_67 = arith.constant 0 : index
    %c0_68 = arith.constant 0 : index
    %169 = vector.load %arg6[%c0_66, %c0_67, %c0_68] : memref<1x8x32xf32, #tpu.memory_space<vmem>>, vector<1x8x32xf32>
    %170 = vector.shape_cast %169 : vector<1x8x32xf32> to vector<8x32xf32>
    %171 = vector.shape_cast %168 : vector<8x32xf32> to vector<1x8x32xf32>
    tpu.vector_store %arg6[%c0_66, %c0_67, %c0_68], %171 {strides = array<i32>} : memref<1x8x32xf32, #tpu.memory_space<vmem>>, vector<1x8x32xf32>,
    return
  }
  func.func @transform_0(%arg0: i32) -> (i32, i32, i32) {
    %c0_i32 = arith.constant 0 : i32
    %c0_i32_0 = arith.constant 0 : i32
    %c0_i32_1 = arith.constant 0 : i32
    return %arg0, %c0_i32, %c0_i32_0 : i32, i32, i32
  }
  func.func @transform_1(%arg0: i32) -> (i32, i32) {
    %c0_i32 = arith.constant 0 : i32
    %c0_i32_0 = arith.constant 0 : i32
    %c0_i32_1 = arith.constant 0 : i32
    return %c0_i32, %c0_i32_0 : i32, i32
  }
  func.func @transform_2(%arg0: i32) -> (i32, i32, i32) {
    %c0_i32 = arith.constant 0 : i32
    %c0_i32_0 = arith.constant 0 : i32
    %c0_i32_1 = arith.constant 0 : i32
    %c0_i32_2 = arith.constant 0 : i32
    return %c0_i32, %c0_i32_0, %c0_i32_1 : i32, i32, i32
  }
  func.func @transform_3(%arg0: i32) -> (i32, i32) {
    %c0_i32 = arith.constant 0 : i32
    %c0_i32_0 = arith.constant 0 : i32
    %c0_i32_1 = arith.constant 0 : i32
    return %c0_i32, %c0_i32_0 : i32, i32
  }
  func.func @transform_4(%arg0: i32) -> (i32, i32) {
    %c0_i32 = arith.constant 0 : i32
    %c0_i32_0 = arith.constant 0 : i32
    %c0_i32_1 = arith.constant 0 : i32
    return %c0_i32, %c0_i32_0 : i32, i32
  }
  func.func @transform_5(%arg0: i32) -> (i32, i32, i32) {
    %c0_i32 = arith.constant 0 : i32
    %c0_i32_0 = arith.constant 0 : i32
    %c0_i32_1 = arith.constant 0 : i32
    return %arg0, %c0_i32, %c0_i32_0 : i32, i32, i32
  }
}

</mosaic_0001>

<bundles_post_ra>
// kernel: attention_forward.1
= control target key start
LH: loop header
LB: loop body
LE: loop exit
PB: predicated region body
PF: predicated region fallthrough
CT: control target
= control target key end

     0   :  { %10 = vsyncpa [#allocation3], 0  ;;  %s3511_s0 = inlined_call_operand.hbm [shape: f32[2,8,32], index: 0, kind: input, shape index: {}]   ;;  %s3512_s1 = inlined_call_operand.hbm [shape: f32[32,96], index: 1, kind: input, shape index: {}]   ;;  %s3513_s2 = inlined_call_operand.hbm [shape: f32[8,8,8], index: 2, kind: input, shape index: {}]   ;;  %s3514_s3 = inlined_call_operand.hbm [shape: f32[32,32], index: 3, kind: input, shape index: {}]   ;;  %s3515_s4 = inlined_call_operand.vmem [shape: f32[1,32], index: 4, kind: input, shape index: {}]   ;;  %s3516_s5 = inlined_call_operand.hbm [shape: f32[2,8,32], index: 5, kind: output, shape index: {}]  }
   0x1   :  { %12 = vsyncpa [#allocation3 + $0x1], 0 }
   0x2   :  { %13 = vsyncpa [#allocation6], 0 }
   0x3   :  { %14 = vsyncpa [#allocation9], 0 }
   0x4   :  { %15 = vsyncpa [#allocation4], 0 }
   0x5   :  { %17 = vsyncpa [#allocation4 + $0x1], 0  ;;  %s3080_s18 = smov 0   ;;  %s3082_s19 = smov 0  }
   0x6   :  { %s3084_s20 = smov 0   ;;  %s3086_s21 = smov 0  }
   0x7 LB: > { %s3101_s22 = sadd.s32 4294967295, %s3015_s21   ;;  %s2440_s23 = sadd.s32 4294967294, %s3015_s21   ;;  %s3015_s21 = sphi %s3086_s21, %s3539_s21   ;;  %s3011_s20 = sphi %s3084_s20, %s3538_s20   ;;  %s3007_s19 = sphi %s3082_s19, %s3537_s19   ;;  %s3003_s18 = sphi %s3080_s18, %s3536_s18  }
   0x8   : > { %p43_p0 = scmp.ne.s32.totalorder %s3007_s19, %s3003_s18  ;;  %p3517_p1 = scmp.eq.s32.totalorder %s3101_s22, 0 }
   0x9   : > { %p157_p3 = scmp.eq.s32.totalorder %s2440_s23, 1  ;;  %p2441_p5 = scmp.ge.s32.totalorder %s3015_s21, 1 }
   0xa   : > { %p3110_p4 = por %p3517_p1, %p43_p0  ;;  %p164_p7 = scmp.lt.s32.totalorder %s3015_s21, 3 }
   0xb   : > { %p3115_p6 = por %p157_p3, %p43_p0  ;;  %s3017_s27 = smov [#allocation5]  }
   0xc   : > { %s3520_s24 = scalar_select %p3110_p4, 1, 0 }
   0xd   : > { %s3521_s25 = scalar_select %p3115_p6, 1, 0 }
   0xe   : > { %p3120_p8 = pnand %p2441_p5, %p164_p7  ;;  %s176_s28 = sshll.u32 %s3017_s27, 4  ;;  %s3124_s28 = int_to_ptr.vmem [resolvable:$true] %s176_s28 }
   0xf   : > { %s3018_s30 = smov [#allocation7]   ;;  %s3019_s7 = smov [#allocation8]  }
  0x10   : > { %s3522_s26 = scalar_select %p3120_p8, 1, 0 }
  0x11   : > { %p2706_p9 = pneg %p3120_p8  ;;  %s189_s6 = sshll.u32 %s3018_s30, 4  ;;  %s3135_s6 = int_to_ptr.vmem [resolvable:$true] %s189_s6 }
  0x12   : > { %s3137_s8 = sshll.u32 %s3019_s7, 4  ;;  %s2827_s11 = scalar_lea.hbm %s3512_s1, 512  ;;  %s203_s8 = int_to_ptr.vmem [resolvable:$true] %s3137_s8 }
  0x13   : > { %p3131_p11 = pnand %p2706_p9, %p3517_p1  ;;  %p2828_p12 = scmp.ne.s32.totalorder %s3512_s1, %s2827_s11 }
  0x14   : > { %p2834_p5 = scmp.lt.u32.totalorder %s2827_s11, %s3512_s1 }
  0x15   : > { %p3147_p13 = pneg %p3131_p11 }
  0x17   : > { %p2830_p0 = pnand %p3147_p13, %p2828_p12 }
  0x19   : > { %p2831_p3 = pneg %p2830_p0 }
  0x1b   : > { %p2836_p7 = pnand %p2834_p5, %p2831_p3 }
  0x1d   : > { %2839 = shalt.err (!%p2836_p7)
}
  0x1e   : > { %s2840_s17 = scalar_lea.vmem %s3124_s28, 512  ;;  %p2848_p2 = scmp.lt.s32.totalorder %s3124_s28, %s3124_s28 }
  0x1f   : > { %p2841_p9 = scmp.ne.s32.totalorder %s3124_s28, %s2840_s17  ;;  %p2849_p6 = scmp.lt.s32.totalorder %s2840_s17, %s2840_s17 }
  0x21   : > { %p2843_p10 = pnand %p2841_p9, %p3147_p13  ;;  %p2850_p12 = por %p2849_p6, %p2848_p2 }
  0x23   : > { %p2844_p1 = pneg %p2843_p10 }
  0x25   : > { %p2851_p0 = pnand %p2850_p12, %p2844_p1 }
  0x27   : > { %2854 = shalt.err (!%p2851_p0)
}
  0x28   : > { %s3020_s23 = smov 128   ;;  %s3021_s27 = smov 8  }
  0x29   : > { %2709 = dma.hbm_to_vmem [thread:$0]  (!%p3131_p11), %s3512_s1, 512, %s3124_s28, [#allocation6], %s3020_s23, %s3020_s23, %s3021_s27  }
  0x2a   : > { %s2855_s11 = scalar_lea.hbm %s3513_s2, 1024 }
  0x2b   : > { %p2856_p1 = scmp.ne.s32.totalorder %s3513_s2, %s2855_s11  ;;  %p2862_p10 = scmp.lt.u32.totalorder %s2855_s11, %s3513_s2 }
  0x2d   : > { %p2858_p2 = pnand %p2856_p1, %p3147_p13 }
  0x2f   : > { %p2859_p6 = pneg %p2858_p2 }
  0x31   : > { %p2864_p3 = pnand %p2862_p10, %p2859_p6 }
  0x33   : > { %2867 = shalt.err (!%p2864_p3)
}
  0x34   : > { %s2868_s28 = scalar_lea.vmem %s3135_s6, 1024  ;;  %p2876_p12 = scmp.lt.s32.totalorder %s3135_s6, %s3135_s6 }
  0x35   : > { %p2869_p5 = scmp.ne.s32.totalorder %s3135_s6, %s2868_s28  ;;  %p2877_p0 = scmp.lt.s32.totalorder %s2868_s28, %s2868_s28 }
  0x37   : > { %p2871_p7 = pnand %p2869_p5, %p3147_p13  ;;  %p2878_p1 = por %p2877_p0, %p2876_p12 }
  0x39   : > { %p2872_p9 = pneg %p2871_p7 }
  0x3b   : > { %p2879_p2 = pnand %p2878_p1, %p2872_p9 }
  0x3d   : > { %2882 = shalt.err (!%p2879_p2)
}
  0x3e   : > { %2712 = dma.hbm_to_vmem [thread:$0]  (!%p3131_p11), %s3513_s2, 1024, %s3135_s6, [#allocation6], %s3020_s23, %s3020_s23, %s3021_s27  }
  0x3f   : > { %s2883_s10 = scalar_lea.hbm %s3514_s3, 512 }
  0x40   : > { %p2884_p6 = scmp.ne.s32.totalorder %s3514_s3, %s2883_s10  ;;  %p2890_p5 = scmp.lt.u32.totalorder %s2883_s10, %s3514_s3 }
  0x42   : > { %p2886_p10 = pnand %p2884_p6, %p3147_p13 }
  0x44   : > { %p2887_p3 = pneg %p2886_p10 }
  0x46   : > { %p2892_p7 = pnand %p2890_p5, %p2887_p3 }
  0x48   : > { %2895 = shalt.err (!%p2892_p7)
}
  0x49   : > { %s2896_s16 = scalar_lea.vmem %s203_s8, 512  ;;  %p2904_p1 = scmp.lt.s32.totalorder %s203_s8, %s203_s8 }
  0x4a   : > { %p2897_p9 = scmp.ne.s32.totalorder %s203_s8, %s2896_s16  ;;  %p2905_p2 = scmp.lt.s32.totalorder %s2896_s16, %s2896_s16 }
  0x4c   : > { %p2899_p12 = pnand %p2897_p9, %p3147_p13  ;;  %p2906_p4 = por %p2905_p2, %p2904_p1 }
  0x4e   : > { %p2900_p0 = pneg %p2899_p12 }
  0x50   : > { %p2907_p8 = pnand %p2906_p4, %p2900_p0 }
  0x52   : > { %2910 = shalt.err (!%p2907_p8)
}
  0x53   : > { %2715 = dma.hbm_to_vmem [thread:$0]  (!%p3131_p11), %s3514_s3, 512, %s203_s8, [#allocation9], %s3020_s23, %s3020_s23, %s3021_s27  }
  0x54   : > { %s3220_s14 = sadd.s32 1, %s3015_s21   ;;  %s30_s17 = sadd.s32 1, %s3011_s20 }
  0x55   : > { %s27_s29 = ssub.s32 %s3015_s21, %s3220_s14  ;;  %p37_p8 = scmp.ne.s32.totalorder %s3011_s20, %s3007_s19 }
  0x56   : > { %p28_p4 = scmp.eq.s32.totalorder %s27_s29, 0  ;;  %p38_p13 = scmp.eq.s32.totalorder %s3015_s21, 0 }
  0x57   : > { %p2727_p6 = scmp.lt.s32.totalorder %s3015_s21, 2  ;;  %p3525_p3 = scmp.eq.s32.totalorder %s3101_s22, 1 }
  0x58   : > { %s3230_s30 = scalar_select %p28_p4, %s3011_s20, %s30_s17  }
  0x59   : > { %p39_p10 = por %p38_p13, %p37_p8  ;;  %p3234_p5 = por %p3525_p3, %p37_p8 }
  0x5a   : > { %s219_s9 = sand.u32 1, %s3011_s20   ;;  %s2447_s10 = sshll.u32 %s3015_s21, 7 }
  0x5b   : > { %s2446_s8 = sshll.u32 %s219_s9, 3  ;;  %s3243_s11 = scalar_lea.hbm %s3511_s0, %s2447_s10 }
  0x5c   : > { %s223_s12 = scalar_lea.vmem [#allocation2], %s2446_s8  ;;  %p3245_p11 = pnand %p2727_p6, %p39_p10 }
  0x5d   : > { %s230_s13 = sshll.u32 %s223_s12, 4  ;;  %s220_s16 = scalar_lea.sflag [#allocation3], %s219_s9  ;;  %s3249_s13 = int_to_ptr.vmem [resolvable:$true] %s230_s13 }
  0x5e   : > { %s2911_s6 = scalar_lea.hbm %s3243_s11, 128  ;;  %p2913_p9 = pneg %p3245_p11 }
  0x5f   : > { %p2912_p7 = scmp.ne.s32.totalorder %s3243_s11, %s2911_s6  ;;  %s2916_s17 = scalar_lea.hbm %s3511_s0, 256 }
  0x60   : > { %p2917_p1 = scmp.lt.u32.totalorder %s3243_s11, %s3511_s0  ;;  %p2918_p2 = scmp.lt.u32.totalorder %s2916_s17, %s2911_s6 }
  0x61   : > { %p2914_p12 = pnand %p2913_p9, %p2912_p7  ;;  %p2920_p8 = scmp.lt.u32.totalorder %s2911_s6, %s3243_s11 }
  0x62   : > { %p2919_p4 = por %p2918_p2, %p2917_p1 }
  0x63   : > { %p2915_p0 = pneg %p2914_p12 }
  0x64   : > { %p2921_p13 = por %p2920_p8, %p2919_p4 }
  0x66   : > { %p2922_p6 = pnand %p2921_p13, %p2915_p0 }
  0x68   : > { %2925 = shalt.err (!%p2922_p6)
}
  0x69   : > { %s2926_s9 = scalar_lea.vmem %s3249_s13, 128  ;;  %s3022_s23 = smov [#allocation2]  }
  0x6a   : > { %p2927_p10 = scmp.ne.s32.totalorder %s3249_s13, %s2926_s9  ;;  %s2931_s27 = sshll.u32 %s3022_s23, 4  ;;  %s2932_s27 = int_to_ptr.vmem [resolvable:$false] %s2931_s27 }
  0x6b   : > { %s2933_s12 = scalar_lea.vmem %s2932_s27, 256  ;;  %p2934_p12 = scmp.lt.s32.totalorder %s3249_s13, %s2932_s27 }
  0x6c   : > { %p2929_p3 = pnand %p2927_p10, %p2913_p9  ;;  %p2935_p1 = scmp.lt.s32.totalorder %s2933_s12, %s2926_s9 }
  0x6e   : > { %p2930_p7 = pneg %p2929_p3  ;;  %p2936_p2 = por %p2935_p1, %p2934_p12 }
  0x70   : > { %p2937_p4 = pnand %p2936_p2, %p2930_p7 }
  0x72   : > { %2940 = shalt.err (!%p2937_p4)
}
  0x73   : > { %2719 = dma.hbm_to_vmem [thread:$0]  (!%p3245_p11), %s3243_s11, 128, %s3249_s13, %s220_s16  }
  0x74   : > { %p3528_p0 = scmp.ne.s32.totalorder %s3522_s26, 0 }
  0x75   : > { %s3279_s6 = sand.u32 (!%p3528_p0), 1, %s3007_s19   ;;  %p3529_p9 = scmp.ne.s32.totalorder (!%p3528_p0), %s3520_s24, 0 }
  0x76   : > { %239 = sbr.rel (%p3528_p0) target bundleno = 4852 (0x12f4), region = 40  ;;  %s2449_s28 = sshll.u32 (!%p3528_p0), %s3279_s6, 3 }
  0x77   : > { %s242_s29 = scalar_lea.sflag (!%p3528_p0), [#allocation3], %s3279_s6  ;;  %s245_s17 = scalar_lea.vmem (!%p3528_p0), [#allocation2], %s2449_s28 }
  0x7d   : > { %2986 = dma.done.wait (%p3529_p9), %s242_s29, 128  }
  0x7e   : > { %2988 = vsyncadd (%p3529_p9), %s242_s29, 4294967168  ;;  %p3530_p11 = scmp.eq.s32.totalorder %s3101_s22, 0 }
  0x80   : > { %2990 = dma.done.wait (%p3530_p11), [#allocation6], 1536   ;;  %p3531_p8 = pmov %p3530_p11 }
  0x82   : > { %2992 = vsyncadd (%p3531_p8), [#allocation6], 4294965760  ;;  %p3532_p13 = pmov %p3531_p8 }
  0x83   : > { %p3533_p6 = pmov %p3531_p8 }
  0x84   : > { %2994 = dma.done.wait (%p3532_p13), [#allocation9], 512  }
  0x85   : > { %2996 = vsyncadd (%p3533_p6), [#allocation9], 4294966784  ;;  %v3023_v0 = vmov 0.0|0.0   ;;  %vm3024_vm0 = vmmov 0   ;;  %v3025_v1 = vmov 0.0   ;;  %v285_v2 = vld [vmem:[#allocation5] sm:$0xff] }
  0x86   : > { %2684 = vmatprep.subr.bf16.mxu0 %v3023_v0  ;;  %2561 = vmatprep.mubr.msk.f32.mxu0 %vm3024_vm0, %v3025_v1  ;;  %v286_v3 = vld [vmem:[#allocation5 + $0x8] sm:$0xff]  ;;  %v287_v4 = vld [vmem:[#allocation5 + $0x10] sm:$0xff]  ;;  %v288_v6 = vld [vmem:[#allocation5 + $0x18] sm:$0xff]  ;;  %vm294_vm1 = vcmask 261120   ;;  %s3026_s24 = smov 124   ;;  %s3027_s26 = smov 96  }
  0x87   : > { %2564 = vmatprep.subr.mxu1 %v3025_v1  ;;  %2566 = vmatprep.mubr.msk.f32.mxu1 %vm3024_vm0, %v3025_v1  ;;  %v2685_v5 = vpack.c.bf16 %v286_v3, %v285_v2  ;;  %v2688_v7 = vpack.c.bf16 %v288_v6, %v287_v4  ;;  %v284_v8 = vld [vmem:[%s245_s17] sm:$0xff]  ;;  %s3028_s11 = smov 92   ;;  %vm372_vm2 = vcmask 31744   ;;  %v368_v14 = vld [vmem:[#allocation7] sm:$0xff]  ;;  %vm447_vm3 = vcmask 64512   ;;  %v536_v18 = vld [vmem:[#allocation7 + $0x8] sm:$0xff] }
  0x88   : > { %s3029_s13 = smov 60   ;;  %s3030_s15 = smov 64   ;;  %v289_v34 = vld [vmem:[#allocation8] sm:$0xff]  ;;  %vm707_vm4 = vcmask 1043456   ;;  %v856_v55 = vld [vmem:[#allocation7 + $0x10] sm:$0xff] }
  0x89   : > { %2686 = vmatpush3.bf16.msra.mxu0 %v2685_v5  ;;  %s3031_s16 = smov 88   ;;  %s3032_s10 = smov 120   ;;  %v703_v35 = vrot.slane %v289_v34, 4 }
  0x8a   : > { %2687 = vmatprep.subr.bf16.mxu0 %v3023_v0  ;;  %s3033_s8 = smov 84   ;;  %s3034_s9 = smov 116  }
  0x8b   : > { %s3035_s23 = smov 56   ;;  %s3036_s27 = smov 52  }
  0x8c   : > { %s3037_s12 = smov 112   ;;  %s3038_s29 = smov 80  }
  0x8d   : > { %2689 = vmatpush3.bf16.msra.mxu0 %v2688_v7  ;;  %s3039_s17 = smov 76  }
  0x8e   : > { %2574 = vmatprep.subr.mxu0 %v3025_v1 }
  0x90   : > { %2562 = vmatmul.mubr.msk.f32.vlgmr.msra.gmra.mrb[0].mxu0 %vm294_vm1, %v284_v8  ;;  %v290_v8 = vld [vmem:[#allocation8 + $0x8] sm:$0xff] }
  0x91   : > { %2576 = vmatprep.mubr.msk.f32.mxu0 %vm3024_vm0, %v3025_v1 }
 0x163   : > { %v3306_v9 = vpop.f32.mrb[0].mxu0 }
 0x164   : > { %537 = vrot.lane.b32.xlu1 %v3306_v9, %s3026_s24  ;;  %370 = vrot.lane.b32.xlu0 %v3306_v9, %s3027_s26  ;;  %v2563_v10 = vpop.f32.mrb[1].mxu0  ;;  %s3040_s24 = smov 108   ;;  %s3041_s26 = smov 48  }
 0x165   : > { %v1266_v10 = vrot.slane %v290_v8, 4 }
 0x168   : > { %539 = vrot.lane.b32.xlu0 %v3306_v9, %s3028_s11  ;;  %s3042_s11 = smov 44  }
 0x1d6   : > { %v371_v11 = vpop.permute.xlu0 %370  ;;  %v538_v13 = vpop.permute.xlu1 %537 }
 0x1d7   : > { %2565 = vmatpush3.xpose.msk.msra.mxu1 %vm372_vm2, %v371_v11 }
 0x1d8   : > { %2569 = vmatprep.subr.mxu1 %v3025_v1 }
 0x1da   : > { %2567 = vmatmul.mubr.msk.f32.vlgmr.msra.gmra.mrb[0].mxu1 %vm372_vm2, %v3306_v9  ;;  %v540_v12 = vpop.permute.xlu0 %539 }
 0x1db   : > { %2575 = vmatpush3.xpose.msk.msra.mxu0 %vm372_vm2, %v540_v12  ;;  %2571 = vmatprep.mubr.msk.f32.mxu1 %vm3024_vm0, %v3025_v1 }
 0x1dc   : > { %2584 = vmatprep.subr.mxu0 %v3025_v1 }
 0x1de   : > { %2577 = vmatmul.mubr.msk.f32.vlgmr.msra.gmra.mrb[2].mxu0 %vm372_vm2, %v538_v13  ;;  %v1100_v13 = vld [vmem:[#allocation7 + $0x18] sm:$0xff] }
 0x1df   : > { %2586 = vmatprep.mubr.msk.f32.mxu0 %vm3024_vm0, %v3025_v1  ;;  %2585 = vmatpush3.msk.msra.mxu0 %vm707_vm4, %v703_v35 }
 0x1e0   : > { %2594 = vmatprep.subr.mxu0 %v3025_v1 }
 0x2ad   : > { %v443_v15 = vpop.f32.mrb[0].mxu1 }
 0x2ae   : > { %v444_v16 = vadd.f32 %v443_v15, %v368_v14  ;;  %v2568_v17 = vpop.f32.mrb[1].mxu1 }
 0x2b0   : > { %v448_v19 = vsel %vm447_vm3, %v444_v16, -inf }
 0x2b1   : > { %449 = vmax.xlane.f32.xlu1 %v448_v19  ;;  %v611_v20 = vpop.f32.mrb[2].mxu0 }
 0x2b2   : > { %v612_v21 = vadd.f32 %v611_v20, %v536_v18  ;;  %v2578_v22 = vpop.f32.mrb[3].mxu0 }
 0x2b4   : > { %v615_v23 = vsel %vm447_vm3, %v612_v21, -inf }
 0x2b5   : > { %616 = vmax.xlane.f32.xlu0 %v615_v23 }
 0x33e   : > { %v450_v24 = vpop.xlane.xlu1 %449 }
 0x33f   : > { %v451_v25 = vsub.f32 %v444_v16, %v450_v24 }
 0x341   : > { %v452_v26 = vmul.f32 1.442695, %v451_v25 }
 0x342   : > { %v617_v27 = vpop.xlane.xlu0 %616 }
 0x343   : > { %2795 = vpow2.f32 %v452_v26  ;;  %v618_v28 = vsub.f32 %v612_v21, %v617_v27 }
 0x345   : > { %v619_v29 = vmul.f32 1.442695, %v618_v28 }
 0x347   : > { %2797 = vpow2.f32 %v619_v29 }
 0x34d   : > { %v2796_v30 = vpop.eup %2795 }
 0x34e   : > { %v454_v31 = vsel %vm447_vm3, %v2796_v30, 0.0 }
 0x34f   : > { %455 = vadd.xlane.f32.xlu0 %v454_v31 }
 0x351   : > { %v2798_v32 = vpop.eup %2797 }
 0x352   : > { %v621_v33 = vsel %vm447_vm3, %v2798_v32, 0.0 }
 0x353   : > { %622 = vadd.xlane.f32.xlu1 %v621_v33 }
 0x364   : > { %626 = vrot.lane.b32.xlu1 %v3306_v9, %s3029_s13  ;;  %s3043_s13 = smov 104  }
 0x365   : > { %459 = vrot.lane.b32.xlu0 %v3306_v9, %s3030_s15  ;;  %s3044_s15 = smov 72  }
 0x368   : > { %859 = vrot.lane.b32.xlu1 %v3306_v9, %s3031_s16  ;;  %s3045_s16 = smov 68  }
 0x369   : > { %857 = vrot.lane.b32.xlu0 %v3306_v9, %s3032_s10  ;;  %s3046_s10 = smov 100  }
 0x3dc   : > { %v456_v36 = vpop.xlane.xlu0 %455 }
 0x3dd   : > { %2799 = vrcp.f32 %v456_v36 }
 0x3e0   : > { %v623_v37 = vpop.xlane.xlu1 %622  ;;  %v460_v38 = vpop.permute.xlu0 %459 }
 0x3e1   : > { %2801 = vrcp.f32 %v623_v37  ;;  %2570 = vmatpush3.msra.mxu1 %v460_v38 }
 0x3e2   : > { %2579 = vmatprep.subr.mxu1 %v3025_v1 }
 0x3e4   : > { %v627_v41 = vpop.permute.xlu1 %626  ;;  %v858_v49 = vpop.permute.xlu0 %857 }
 0x3e7   : > { %v2800_v39 = vpop.eup %2799 }
 0x3e8   : > { %v458_v40 = vmul.f32 %v2800_v39, %v2796_v30  ;;  %v860_v47 = vpop.permute.xlu1 %859 }
 0x3ea   : > { %2572 = vmatmul.mubr.msk.f32.vlgmr.msra.gmra.mrb[2].mxu1 %vm447_vm3, %v458_v40 }
 0x3eb   : > { %v2802_v42 = vpop.eup %2801  ;;  %2580 = vmatpush3.msra.mxu1 %v627_v41  ;;  %2581 = vmatprep.mubr.msk.f32.mxu1 %vm3024_vm0, %v3025_v1 }
 0x3ec   : > { %v625_v43 = vmul.f32 %v2802_v42, %v2798_v32  ;;  %2589 = vmatprep.subr.mxu1 %v3025_v1 }
 0x3ee   : > { %2582 = vmatmul.mubr.msk.f32.vlgmr.msra.gmra.mrb[4].mxu1 %vm447_vm3, %v625_v43 }
 0x3ef   : > { %2590 = vmatpush3.msk.msra.mxu1 %vm707_vm4, %v289_v34  ;;  %2591 = vmatprep.mubr.msk.f32.mxu1 %vm3024_vm0, %v3025_v1  ;;  %v1344_v34 = vld [vmem:[#allocation7 + $0x20] sm:$0xff] }
 0x3f0   : > { %2599 = vmatprep.subr.mxu1 %v3025_v1 }
 0x4bd   : > { %v531_v44 = vpop.f32.mrb[2].mxu1 }
 0x4be   : > { %v2573_v45 = vpop.f32.mrb[3].mxu1  ;;  %2592 = vmatmul.mubr.msk.f32.vlgmr.msra.gmra.mrb[6].mxu1 %vm372_vm2, %v531_v44 }
 0x4bf   : > { %2601 = vmatprep.mubr.msk.f32.mxu1 %vm3024_vm0, %v3025_v1 }
 0x4c1   : > { %v698_v46 = vpop.f32.mrb[4].mxu1 }
 0x4c2   : > { %v2583_v48 = vpop.f32.mrb[5].mxu1  ;;  %2587 = vmatmul.mubr.msk.f32.vlgmr.msra.gmra.mrb[4].mxu0 %vm372_vm2, %v698_v46 }
 0x4c3   : > { %2595 = vmatpush3.xpose.msk.msra.mxu0 %vm372_vm2, %v860_v47  ;;  %2596 = vmatprep.mubr.msk.f32.mxu0 %vm3024_vm0, %v3025_v1 }
 0x4c4   : > { %2604 = vmatprep.subr.mxu0 %v3025_v1 }
 0x4c6   : > { %2597 = vmatmul.mubr.msk.f32.vlgmr.msra.gmra.mrb[6].mxu0 %vm372_vm2, %v858_v49 }
 0x4c7   : > { %2606 = vmatprep.mubr.msk.f32.mxu0 %vm3024_vm0, %v3025_v1  ;;  %2605 = vmatpush3.msk.msra.mxu0 %vm707_vm4, %v290_v8 }
 0x4c8   : > { %2614 = vmatprep.subr.mxu0 %v3025_v1 }
 0x591   : > { %v851_v50 = vpop.f32.mrb[6].mxu1 }
 0x592   : > { %v2593_v51 = vpop.f32.mrb[7].mxu1 }
 0x595   : > { %v776_v52 = vpop.f32.mrb[4].mxu0 }
 0x596   : > { %v3353_v53 = vadd.f32 %v851_v50, %v776_v52  ;;  %v2588_v54 = vpop.f32.mrb[5].mxu0 }
 0x599   : > { %v931_v56 = vpop.f32.mrb[6].mxu0 }
 0x59a   : > { %v932_v57 = vadd.f32 %v931_v56, %v856_v55  ;;  %v2598_v58 = vpop.f32.mrb[7].mxu0 }
 0x59c   : > { %v935_v59 = vsel %vm447_vm3, %v932_v57, -inf }
 0x59d   : > { %936 = vmax.xlane.f32.xlu1 %v935_v59 }
 0x5ae   : > { %1103 = vrot.lane.b32.xlu1 %v3306_v9, %s3033_s8  ;;  %s3047_s8 = smov 40  }
 0x5b2   : > { %1101 = vrot.lane.b32.xlu1 %v3306_v9, %s3034_s9  ;;  %s3048_s9 = smov 36  }
 0x62a   : > { %v937_v60 = vpop.xlane.xlu1 %936 }
 0x62b   : > { %v938_v61 = vsub.f32 %v932_v57, %v937_v60  ;;  %v1588_v57 = vld [vmem:[#allocation7 + $0x28] sm:$0xff] }
 0x62d   : > { %v939_v62 = vmul.f32 1.442695, %v938_v61 }
 0x62e   : > { %v1104_v5 = vpop.permute.xlu1 %1103 }
 0x62f   : > { %2803 = vpow2.f32 %v939_v62 }
 0x632   : > { %v1102_v7 = vpop.permute.xlu1 %1101 }
 0x639   : > { %v2804_v63 = vpop.eup %2803 }
 0x63a   : > { %v941_v0 = vsel %vm447_vm3, %v2804_v63, 0.0 }
 0x63b   : > { %942 = vadd.xlane.f32.xlu0 %v941_v0 }
 0x651   : > { %946 = vrot.lane.b32.xlu0 %v3306_v9, %s3035_s23 }
 0x6c8   : > { %v943_v2 = vpop.xlane.xlu0 %942 }
 0x6c9   : > { %2805 = vrcp.f32 %v943_v2 }
 0x6cc   : > { %v947_v3 = vpop.permute.xlu0 %946 }
 0x6cd   : > { %2600 = vmatpush3.msra.mxu1 %v947_v3 }
 0x6ce   : > { %2609 = vmatprep.subr.mxu1 %v3025_v1 }
 0x6d3   : > { %v2806_v4 = vpop.eup %2805 }
 0x6d4   : > { %v945_v6 = vmul.f32 %v2806_v4, %v2804_v63 }
 0x6d6   : > { %2602 = vmatmul.mubr.msk.f32.vlgmr.msra.gmra.mrb[8].mxu1 %vm447_vm3, %v945_v6 }
 0x6d7   : > { %2610 = vmatpush3.xpose.msk.msra.mxu1 %vm372_vm2, %v1104_v5  ;;  %2611 = vmatprep.mubr.msk.f32.mxu1 %vm3024_vm0, %v3025_v1 }
 0x6d8   : > { %2619 = vmatprep.subr.mxu1 %v3025_v1 }
 0x6da   : > { %2612 = vmatmul.mubr.msk.f32.vlgmr.msra.gmra.mrb[10].mxu1 %vm372_vm2, %v1102_v7 }
 0x6db   : > { %2621 = vmatprep.mubr.msk.f32.mxu1 %vm3024_vm0, %v3025_v1  ;;  %2620 = vmatpush3.msk.msra.mxu1 %vm707_vm4, %v1266_v10 }
 0x6dc   : > { %2629 = vmatprep.subr.mxu1 %v3025_v1 }
 0x7a9   : > { %v1018_v11 = vpop.f32.mrb[8].mxu1 }
 0x7aa   : > { %v2603_v12 = vpop.f32.mrb[9].mxu1  ;;  %2607 = vmatmul.mubr.msk.f32.vlgmr.msra.gmra.mrb[8].mxu0 %vm372_vm2, %v1018_v11 }
 0x7ab   : > { %2616 = vmatprep.mubr.msk.f32.mxu0 %vm3024_vm0, %v3025_v1 }
 0x7ad   : > { %v1175_v14 = vpop.f32.mrb[10].mxu1 }
 0x7ae   : > { %v1176_v15 = vadd.f32 %v1175_v14, %v1100_v13  ;;  %v2613_v16 = vpop.f32.mrb[11].mxu1 }
 0x7af   : > { %v1832_v16 = vld [vmem:[#allocation7 + $0x30] sm:$0xff] }
 0x7b0   : > { %v1179_v17 = vsel %vm447_vm3, %v1176_v15, -inf }
 0x7b1   : > { %1180 = vmax.xlane.f32.xlu0 %v1179_v17 }
 0x7c7   : > { %1190 = vrot.lane.b32.xlu0 %v3306_v9, %s3036_s27 }
 0x7cb   : > { %1345 = vrot.lane.b32.xlu0 %v3306_v9, %s3037_s12  ;;  %s2497_s12 = sshll.u32 %s3101_s22, 7 }
 0x83e   : > { %v1181_v18 = vpop.xlane.xlu0 %1180 }
 0x83f   : > { %v1182_v19 = vsub.f32 %v1176_v15, %v1181_v18 }
 0x841   : > { %v1183_v20 = vmul.f32 1.442695, %v1182_v19 }
 0x842   : > { %v1191_v21 = vpop.permute.xlu0 %1190 }
 0x843   : > { %2807 = vpow2.f32 %v1183_v20  ;;  %2615 = vmatpush3.msra.mxu0 %v1191_v21 }
 0x844   : > { %2624 = vmatprep.subr.mxu0 %v3025_v1 }
 0x846   : > { %v1346_v31 = vpop.permute.xlu0 %1345 }
 0x84d   : > { %v2808_v22 = vpop.eup %2807 }
 0x84e   : > { %v1185_v23 = vsel %vm447_vm3, %v2808_v22, 0.0 }
 0x84f   : > { %1186 = vadd.xlane.f32.xlu1 %v1185_v23 }
 0x860   : > { %1347 = vrot.lane.b32.xlu1 %v3306_v9, %s3038_s29  ;;  %s283_s29 = scalar_lea.vmem [#allocation10], %s2449_s28  ;;  %s3049_s28 = smov [#allocation10]  }
 0x87d   : > { %v1094_v24 = vpop.f32.mrb[8].mxu0 }
 0x87e   : > { %v1098_v25 = vadd.f32 %v1094_v24, %v3353_v53  ;;  %v2608_v26 = vpop.f32.mrb[9].mxu0  ;;  %v291_v53 = vld [vmem:[#allocation8 + $0x10] sm:$0xff] }
 0x87f   : > { %v1754_v54 = vrot.slane %v291_v53, 4 }
 0x8dc   : > { %v1187_v27 = vpop.xlane.xlu1 %1186 }
 0x8dd   : > { %2809 = vrcp.f32 %v1187_v27 }
 0x8e0   : > { %v1348_v30 = vpop.permute.xlu1 %1347 }
 0x8e7   : > { %v2810_v28 = vpop.eup %2809 }
 0x8e8   : > { %v1189_v29 = vmul.f32 %v2810_v28, %v2808_v22 }
 0x8ea   : > { %2617 = vmatmul.mubr.msk.f32.vlgmr.msra.gmra.mrb[10].mxu0 %vm447_vm3, %v1189_v29 }
 0x8eb   : > { %2625 = vmatpush3.xpose.msk.msra.mxu0 %vm372_vm2, %v1348_v30  ;;  %2626 = vmatprep.mubr.msk.f32.mxu0 %vm3024_vm0, %v3025_v1 }
 0x8ec   : > { %2634 = vmatprep.subr.mxu0 %v3025_v1 }
 0x8ee   : > { %2627 = vmatmul.mubr.msk.f32.vlgmr.msra.gmra.mrb[12].mxu0 %vm372_vm2, %v1346_v31 }
 0x8ef   : > { %2636 = vmatprep.mubr.msk.f32.mxu0 %vm3024_vm0, %v3025_v1  ;;  %2635 = vmatpush3.msk.msra.mxu0 %vm707_vm4, %v291_v53 }
 0x8f0   : > { %2644 = vmatprep.subr.mxu0 %v3025_v1 }
 0x9bd   : > { %v1262_v32 = vpop.f32.mrb[10].mxu0 }
 0x9be   : > { %v2618_v33 = vpop.f32.mrb[11].mxu0  ;;  %2622 = vmatmul.mubr.msk.f32.vlgmr.msra.gmra.mrb[12].mxu1 %vm372_vm2, %v1262_v32 }
 0x9bf   : > { %2631 = vmatprep.mubr.msk.f32.mxu1 %vm3024_vm0, %v3025_v1 }
 0x9c1   : > { %v1419_v35 = vpop.f32.mrb[12].mxu0 }
 0x9c2   : > { %v1420_v36 = vadd.f32 %v1419_v35, %v1344_v34  ;;  %v2628_v37 = vpop.f32.mrb[13].mxu0  ;;  %v292_v35 = vld [vmem:[#allocation8 + $0x18] sm:$0xff] }
 0x9c4   : > { %v1423_v38 = vsel %vm447_vm3, %v1420_v36, -inf }
 0x9c5   : > { %1424 = vmax.xlane.f32.xlu1 %v1423_v38 }
 0x9d6   : > { %1591 = vrot.lane.b32.xlu1 %v3306_v9, %s3039_s17  ;;  %s2341_s17 = sshll.u32 %s283_s29, 4  ;;  %s3468_s17 = int_to_ptr.vmem [resolvable:$true] %s2341_s17 }
 0x9d7   : > { %s2941_s22 = scalar_lea.vmem %s3468_s17, 128 }
 0x9d8   : > { %p2942_p10 = scmp.ne.s32.totalorder %s3468_s17, %s2941_s22 }
 0x9da   : > { %1589 = vrot.lane.b32.xlu1 %v3306_v9, %s3040_s24  ;;  %p2943_p3 = pnand %p2942_p10, %p3234_p5 }
 0x9dc   : > { %p2944_p7 = pneg %p2943_p3 }
 0xa52   : > { %v1425_v39 = vpop.xlane.xlu1 %1424 }
 0xa53   : > { %v1426_v40 = vsub.f32 %v1420_v36, %v1425_v39  ;;  %v2242_v36 = vrot.slane %v292_v35, 4  ;;  %v2076_v39 = vld [vmem:[#allocation7 + $0x38] sm:$0xff] }
 0xa55   : > { %v1427_v41 = vmul.f32 1.442695, %v1426_v40 }
 0xa56   : > { %v1592_v50 = vpop.permute.xlu1 %1591 }
 0xa57   : > { %2811 = vpow2.f32 %v1427_v41 }
 0xa5a   : > { %v1590_v52 = vpop.permute.xlu1 %1589 }
 0xa61   : > { %v2812_v42 = vpop.eup %2811 }
 0xa62   : > { %v1429_v43 = vsel %vm447_vm3, %v2812_v42, 0.0 }
 0xa63   : > { %1430 = vadd.xlane.f32.xlu0 %v1429_v43 }
 0xa79   : > { %1434 = vrot.lane.b32.xlu0 %v3306_v9, %s3041_s26 }
 0xa91   : > { %v1338_v44 = vpop.f32.mrb[12].mxu1 }
 0xa92   : > { %v1342_v45 = vadd.f32 %v1338_v44, %v1098_v25  ;;  %v2623_v46 = vpop.f32.mrb[13].mxu1 }
 0xaf0   : > { %v1431_v47 = vpop.xlane.xlu0 %1430 }
 0xaf1   : > { %2813 = vrcp.f32 %v1431_v47 }
 0xaf4   : > { %v1435_v48 = vpop.permute.xlu0 %1434 }
 0xaf5   : > { %2630 = vmatpush3.msra.mxu1 %v1435_v48 }
 0xaf6   : > { %2639 = vmatprep.subr.mxu1 %v3025_v1 }
 0xafb   : > { %v2814_v49 = vpop.eup %2813 }
 0xafc   : > { %v1433_v51 = vmul.f32 %v2814_v49, %v2812_v42 }
 0xafe   : > { %2632 = vmatmul.mubr.msk.f32.vlgmr.msra.gmra.mrb[14].mxu1 %vm447_vm3, %v1433_v51 }
 0xaff   : > { %2640 = vmatpush3.xpose.msk.msra.mxu1 %vm372_vm2, %v1592_v50  ;;  %2641 = vmatprep.mubr.msk.f32.mxu1 %vm3024_vm0, %v3025_v1 }
 0xb00   : > { %2649 = vmatprep.subr.mxu1 %v3025_v1 }
 0xb02   : > { %2642 = vmatmul.mubr.msk.f32.vlgmr.msra.gmra.mrb[16].mxu1 %vm372_vm2, %v1590_v52 }
 0xb03   : > { %2651 = vmatprep.mubr.msk.f32.mxu1 %vm3024_vm0, %v3025_v1  ;;  %2650 = vmatpush3.msk.msra.mxu1 %vm707_vm4, %v1754_v54 }
 0xb04   : > { %2659 = vmatprep.subr.mxu1 %v3025_v1 }
 0xbd1   : > { %v1506_v55 = vpop.f32.mrb[14].mxu1 }
 0xbd2   : > { %v2633_v56 = vpop.f32.mrb[15].mxu1  ;;  %2637 = vmatmul.mubr.msk.f32.vlgmr.msra.gmra.mrb[14].mxu0 %vm372_vm2, %v1506_v55 }
 0xbd3   : > { %2646 = vmatprep.mubr.msk.f32.mxu0 %vm3024_vm0, %v3025_v1  ;;  %v2495_v56 = vld [vmem:[%s3515_s4] ss:$0 sm:$0xff] }
 0xbd5   : > { %v1663_v58 = vpop.f32.mrb[16].mxu1 }
 0xbd6   : > { %v1664_v59 = vadd.f32 %v1663_v58, %v1588_v57  ;;  %v2643_v60 = vpop.f32.mrb[17].mxu1 }
 0xbd8   : > { %v1667_v61 = vsel %vm447_vm3, %v1664_v59, -inf }
 0xbd9   : > { %1668 = vmax.xlane.f32.xlu0 %v1667_v61 }
 0xbef   : > { %1678 = vrot.lane.b32.xlu0 %v3306_v9, %s3042_s11  ;;  %s3466_s11 = scalar_lea.hbm %s3516_s5, %s2497_s12 }
 0xbf3   : > { %1833 = vrot.lane.b32.xlu0 %v3306_v9, %s3043_s13  ;;  %s2328_s13 = scalar_lea.sflag [#allocation4], %s3279_s6 }
 0xc66   : > { %v1669_v62 = vpop.xlane.xlu0 %1668 }
 0xc67   : > { %v1670_v63 = vsub.f32 %v1664_v59, %v1669_v62 }
 0xc69   : > { %v1671_v0 = vmul.f32 1.442695, %v1670_v63 }
 0xc6a   : > { %v1679_v2 = vpop.permute.xlu0 %1678 }
 0xc6b   : > { %2815 = vpow2.f32 %v1671_v0  ;;  %2645 = vmatpush3.msra.mxu0 %v1679_v2 }
 0xc6c   : > { %2654 = vmatprep.subr.mxu0 %v3025_v1 }
 0xc6e   : > { %v1834_v13 = vpop.permute.xlu0 %1833 }
 0xc75   : > { %v2816_v3 = vpop.eup %2815 }
 0xc76   : > { %v1673_v4 = vsel %vm447_vm3, %v2816_v3, 0.0 }
 0xc77   : > { %1674 = vadd.xlane.f32.xlu1 %v1673_v4 }
 0xc88   : > { %1835 = vrot.lane.b32.xlu1 %v3306_v9, %s3044_s15  ;;  %s2945_s15 = sshll.u32 %s3049_s28, 4  ;;  %s2946_s15 = int_to_ptr.vmem [resolvable:$false] %s2945_s15 }
 0xc89   : > { %p2948_p12 = scmp.lt.s32.totalorder %s3468_s17, %s2946_s15 }
 0xca5   : > { %v1582_v5 = vpop.f32.mrb[14].mxu0 }
 0xca6   : > { %v1586_v6 = vadd.f32 %v1582_v5, %v1342_v45  ;;  %v2638_v7 = vpop.f32.mrb[15].mxu0 }
 0xd04   : > { %v1675_v8 = vpop.xlane.xlu1 %1674 }
 0xd05   : > { %2817 = vrcp.f32 %v1675_v8 }
 0xd08   : > { %v1836_v12 = vpop.permute.xlu1 %1835 }
 0xd0f   : > { %v2818_v10 = vpop.eup %2817 }
 0xd10   : > { %v1677_v11 = vmul.f32 %v2818_v10, %v2816_v3 }
 0xd12   : > { %2647 = vmatmul.mubr.msk.f32.vlgmr.msra.gmra.mrb[16].mxu0 %vm447_vm3, %v1677_v11 }
 0xd13   : > { %2655 = vmatpush3.xpose.msk.msra.mxu0 %vm372_vm2, %v1836_v12  ;;  %2656 = vmatprep.mubr.msk.f32.mxu0 %vm3024_vm0, %v3025_v1 }
 0xd14   : > { %2664 = vmatprep.subr.mxu0 %v3025_v1 }
 0xd16   : > { %2657 = vmatmul.mubr.msk.f32.vlgmr.msra.gmra.mrb[18].mxu0 %vm372_vm2, %v1834_v13 }
 0xd17   : > { %2666 = vmatprep.mubr.msk.f32.mxu0 %vm3024_vm0, %v3025_v1  ;;  %2665 = vmatpush3.msk.msra.mxu0 %vm707_vm4, %v292_v35 }
 0xd18   : > { %2674 = vmatprep.subr.mxu0 %v3025_v1 }
 0xde5   : > { %v1750_v14 = vpop.f32.mrb[16].mxu0 }
 0xde6   : > { %v2648_v15 = vpop.f32.mrb[17].mxu0  ;;  %2652 = vmatmul.mubr.msk.f32.vlgmr.msra.gmra.mrb[18].mxu1 %vm372_vm2, %v1750_v14 }
 0xde7   : > { %2661 = vmatprep.mubr.msk.f32.mxu1 %vm3024_vm0, %v3025_v1 }
 0xde9   : > { %v1907_v17 = vpop.f32.mrb[18].mxu0 }
 0xdea   : > { %v1908_v18 = vadd.f32 %v1907_v17, %v1832_v16  ;;  %v2658_v19 = vpop.f32.mrb[19].mxu0 }
 0xdec   : > { %v1911_v20 = vsel %vm447_vm3, %v1908_v18, -inf }
 0xded   : > { %1912 = vmax.xlane.f32.xlu1 %v1911_v20 }
 0xdfe   : > { %2079 = vrot.lane.b32.xlu1 %v3306_v9, %s3045_s16  ;;  %s2947_s16 = scalar_lea.vmem %s2946_s15, 256 }
 0xdff   : > { %p2949_p1 = scmp.lt.s32.totalorder %s2947_s16, %s2941_s22 }
 0xe01   : > { %p2950_p2 = por %p2949_p1, %p2948_p12 }
 0xe02   : > { %2077 = vrot.lane.b32.xlu1 %v3306_v9, %s3046_s10 }
 0xe03   : > { %p2951_p4 = pnand %p2950_p2, %p2944_p7 }
 0xe7a   : > { %v1913_v21 = vpop.xlane.xlu1 %1912 }
 0xe7b   : > { %v1914_v22 = vsub.f32 %v1908_v18, %v1913_v21 }
 0xe7d   : > { %v1915_v23 = vmul.f32 1.442695, %v1914_v22 }
 0xe7e   : > { %v2080_v32 = vpop.permute.xlu1 %2079 }
 0xe7f   : > { %2819 = vpow2.f32 %v1915_v23 }
 0xe82   : > { %v2078_v34 = vpop.permute.xlu1 %2077 }
 0xe89   : > { %v2820_v24 = vpop.eup %2819 }
 0xe8a   : > { %v1917_v25 = vsel %vm447_vm3, %v2820_v24, 0.0 }
 0xe8b   : > { %1918 = vadd.xlane.f32.xlu0 %v1917_v25 }
 0xea1   : > { %1922 = vrot.lane.b32.xlu0 %v3306_v9, %s3047_s8 }
 0xeb9   : > { %v1826_v26 = vpop.f32.mrb[18].mxu1 }
 0xeba   : > { %v1830_v27 = vadd.f32 %v1826_v26, %v1586_v6  ;;  %v2653_v28 = vpop.f32.mrb[19].mxu1 }
 0xf18   : > { %v1919_v29 = vpop.xlane.xlu0 %1918 }
 0xf19   : > { %2821 = vrcp.f32 %v1919_v29 }
 0xf1c   : > { %v1923_v30 = vpop.permute.xlu0 %1922 }
 0xf1d   : > { %2660 = vmatpush3.msra.mxu1 %v1923_v30 }
 0xf1e   : > { %2669 = vmatprep.subr.mxu1 %v3025_v1 }
 0xf23   : > { %v2822_v31 = vpop.eup %2821 }
 0xf24   : > { %v1921_v33 = vmul.f32 %v2822_v31, %v2820_v24 }
 0xf26   : > { %2662 = vmatmul.mubr.msk.f32.vlgmr.msra.gmra.mrb[20].mxu1 %vm447_vm3, %v1921_v33 }
 0xf27   : > { %2670 = vmatpush3.xpose.msk.msra.mxu1 %vm372_vm2, %v2080_v32  ;;  %2671 = vmatprep.mubr.msk.f32.mxu1 %vm3024_vm0, %v3025_v1 }
 0xf28   : > { %2679 = vmatprep.subr.mxu1 %v3025_v1 }
 0xf2a   : > { %2672 = vmatmul.mubr.msk.f32.vlgmr.msra.gmra.mrb[22].mxu1 %vm372_vm2, %v2078_v34 }
 0xf2b   : > { %2681 = vmatprep.mubr.msk.f32.mxu1 %vm3024_vm0, %v3025_v1  ;;  %2680 = vmatpush3.msk.msra.mxu1 %vm707_vm4, %v2242_v36 }
 0xff9   : > { %v1994_v37 = vpop.f32.mrb[20].mxu1 }
 0xffa   : > { %v2663_v38 = vpop.f32.mrb[21].mxu1  ;;  %2667 = vmatmul.mubr.msk.f32.vlgmr.msra.gmra.mrb[20].mxu0 %vm372_vm2, %v1994_v37 }
 0xffb   : > { %2676 = vmatprep.mubr.msk.f32.mxu0 %vm3024_vm0, %v3025_v1 }
 0xffd   : > { %v2151_v40 = vpop.f32.mrb[22].mxu1 }
 0xffe   : > { %v2152_v41 = vadd.f32 %v2151_v40, %v2076_v39  ;;  %v2673_v42 = vpop.f32.mrb[23].mxu1 }
0x1000   : > { %v2155_v43 = vsel %vm447_vm3, %v2152_v41, -inf }
0x1001   : > { %2156 = vmax.xlane.f32.xlu0 %v2155_v43 }
0x1017   : > { %2166 = vrot.lane.b32.xlu0 %v3306_v9, %s3048_s9 }
0x108e   : > { %v2157_v44 = vpop.xlane.xlu0 %2156 }
0x108f   : > { %v2158_v45 = vsub.f32 %v2152_v41, %v2157_v44 }
0x1091   : > { %v2159_v46 = vmul.f32 1.442695, %v2158_v45 }
0x1092   : > { %v2167_v47 = vpop.permute.xlu0 %2166 }
0x1093   : > { %2823 = vpow2.f32 %v2159_v46  ;;  %2675 = vmatpush3.msra.mxu0 %v2167_v47 }
0x109d   : > { %v2824_v48 = vpop.eup %2823 }
0x109e   : > { %v2161_v49 = vsel %vm447_vm3, %v2824_v48, 0.0 }
0x109f   : > { %2162 = vadd.xlane.f32.xlu1 %v2161_v49 }
0x10cd   : > { %v2070_v1 = vpop.f32.mrb[20].mxu0 }
0x10ce   : > { %v2074_v50 = vadd.f32 %v2070_v1, %v1830_v27  ;;  %v2668_v51 = vpop.f32.mrb[21].mxu0 }
0x112c   : > { %v2163_v52 = vpop.xlane.xlu1 %2162 }
0x112d   : > { %2825 = vrcp.f32 %v2163_v52 }
0x1137   : > { %v2826_v53 = vpop.eup %2825 }
0x1138   : > { %v2165_v54 = vmul.f32 %v2826_v53, %v2824_v48 }
0x113a   : > { %2677 = vmatmul.mubr.msk.f32.vlgmr.msra.gmra.mrb[22].mxu0 %vm447_vm3, %v2165_v54 }
0x120d   : > { %v2238_v9 = vpop.f32.mrb[22].mxu0 }
0x120e   : > { %v2678_v55 = vpop.f32.mrb[23].mxu0  ;;  %2682 = vmatmul.mubr.msk.f32.vlgmr.msra.gmra.mrb[24].mxu1 %vm372_vm2, %v2238_v9 }
0x12e1   : > { %v2314_v57 = vpop.f32.mrb[24].mxu1 }
0x12e2   : > { %v2318_v58 = vadd.f32 %v2314_v57, %v2074_v50  ;;  %v2683_v59 = vpop.f32.mrb[25].mxu1 }
0x12e4   : > { %v2325_v60 = vadd.f32 %v2495_v56, %v2318_v58 }
0x12e6   : > { %2326 = vst.msk [vmem:[%s283_s29] sm:$0xff] %vm294_vm1, %v2325_v60 }
0x12e7   : > { %2954 = shalt.err (!%p2951_p4)
}
0x12e8   : > { %s2955_s6 = scalar_lea.hbm %s3466_s11, 128  ;;  %s2959_s9 = scalar_lea.hbm %s3516_s5, 256 }
0x12e9   : > { %p2956_p0 = scmp.ne.s32.totalorder %s3466_s11, %s2955_s6  ;;  %p2960_p8 = scmp.lt.u32.totalorder %s3466_s11, %s3516_s5 }
0x12ea   : > { %p2961_p13 = scmp.lt.u32.totalorder %s2959_s9, %s2955_s6  ;;  %p2963_p10 = scmp.lt.u32.totalorder %s2955_s6, %s3466_s11 }
0x12eb   : > { %p2957_p9 = pnand %p2956_p0, %p3234_p5 }
0x12ec   : > { %p2962_p6 = por %p2961_p13, %p2960_p8 }
0x12ed   : > { %p2958_p11 = pneg %p2957_p9 }
0x12ee   : > { %p2964_p3 = por %p2963_p10, %p2962_p6 }
0x12f0   : > { %p2965_p7 = pnand %p2964_p3, %p2958_p11 }
0x12f2   : > { %2968 = shalt.err (!%p2965_p7)
}
0x12f3   : > { %2704 = dma.vmem_to_hbm [thread:$0]  (%p3234_p5), %s3468_s17, 128, %s3466_s11, %s2328_s13  }
0x12f4 PF: > { %s2353_s12 = sand.u32 1, %s3003_s18   ;;  %p3534_p12 = scmp.ne.s32.totalorder %s3521_s25, 0 }
0x12f5   : > { %p3535_p1 = scmp.ge.s32.totalorder %s3015_s21, 2  ;;  %s2354_s29 = scalar_lea.sflag [#allocation4], %s2353_s12 }
0x12f7   : > { %p2721_p2 = pnand %p3535_p1, %p3534_p12 }
0x12f9   : > { %2998 = dma.done.wait (!%p2721_p2), %s2354_s29, 128  }
0x12fa   : > { %3000 = vsyncadd (!%p2721_p2), %s2354_s29, 4294967168  ;;  %p20_p4 = scmp.ge.s32.totalorder %s3220_s14, 4   ;;  %s3536_s18 = smov %s3007_s19 }
0x12fb   : > { %s3537_s19 = smov %s3011_s20  ;;  %s3538_s20 = smov %s3230_s30 }
0x12fc   : > { %s3539_s21 = smov %s3220_s14  ;;  %22 = sbr.rel (!%p20_p4) target bundleno = 7 (0x7), region = 104 }
0x1303   :  { %2359 = vsyncpa [#allocation3], 1 }
0x1304   :  { %2361 = vsyncpa [#allocation3 + $0x1], 1 }
0x1305   :  { %2362 = vsyncpa [#allocation6], 1 }
0x1306   :  { %2363 = vsyncpa [#allocation9], 1 }
0x1307   :  { %2364 = vsyncpa [#allocation4], 1 }
0x1308   :  { %2366 = vsyncpa [#allocation4 + $0x1], 1 }

</bundles_post_ra>
